<compile_context>
chip_gen: v6e
topology: v6e:2x2x1
jax: 0.10.0
libtpu: 0.0.40
codegen_flags: <defaults>
</compile_context>

<pallas_src>
import jax
import jax.numpy as jnp
from jax.experimental import pallas as pl
from jax.experimental.pallas import tpu as pltpu


def _round_up(x, m):
    return ((x + m - 1) // m) * m


# ----------------------- generation-aware tiling defaults ---------------------
def _tpu_vmem_bytes():
    """Physical VMEM per core; falls back to the v7x-safe 64 MiB if unknown."""
    try:
        info = pltpu.get_tpu_info()
        v = int(getattr(info, "vmem_capacity_bytes", 0) or 0)
        if v > 0:
            return v
    except Exception:
        pass
    return 64 * 1024 * 1024


_PHYS_VMEM = _tpu_vmem_bytes()
# v5e / v6e: 128 MiB VMEM -> large tiles, 64 MiB scoped limit.
# v7x: 64 MiB VMEM -> smaller tiles, keep the scoped limit around 32 MiB.
_DEFAULT_TILE_M = 8192 if _PHYS_VMEM >= 100 * 1024 * 1024 else 4096
_VMEM_LIMIT = min(64 * 1024 * 1024, _PHYS_VMEM // 2)


# ----------------------------- Pallas kernel ----------------------------------
def _patch_proj_kernel(x_ref, w_ref, b_ref, o_ref):
    # x_ref: (TM, K) patch rows (bf16/f32), w_ref: (K, E), b_ref: (1, E) f32.
    acc = jnp.dot(x_ref[...], w_ref[...], preferred_element_type=jnp.float32)
    o_ref[...] = (acc + b_ref[...]).astype(o_ref.dtype)


def _choose_tm(M, K, E, in_itemsize, out_itemsize, tile_m, vmem_limit):
    """Pick an M-tile: legal ((tm % 8 == 0) or tm == M), VMEM-bounded, >= 2 steps."""
    if M <= 16:
        return M                      # single full block is always legal
    # Double-buffered activation + output tiles must fit well under the limit
    # (weight/bias are a few KiB and grid-invariant).
    per_row = 2 * (K * in_itemsize + E * out_itemsize)
    budget_rows = max(8, int(vmem_limit * 0.5) // max(per_row, 1))
    tm = min(tile_m, budget_rows)
    # Keep at least 2 grid steps: both v7x TensorCores get work ("parallel" axis)
    # and the BlockSpec pipeline has something to overlap.
    tm = min(tm, _round_up(pl.cdiv(M, 2), 8))
    tm = max(8, (tm // 8) * 8)
    return tm


def _patch_proj(patches, weight, bias2d, out_dtype, *,
                tile_m=_DEFAULT_TILE_M, vmem_limit=_VMEM_LIMIT):
    """patches: (M, K), weight: (K, E), bias2d: (1, E) f32 -> (M, E) out_dtype."""
    M, K = patches.shape
    Kw, E = weight.shape
    assert Kw == K and bias2d.shape == (1, E)

    in_item = jnp.dtype(patches.dtype).itemsize
    w_item = jnp.dtype(weight.dtype).itemsize
    out_item = jnp.dtype(out_dtype).itemsize

    tm = _choose_tm(M, K, E, in_item, out_item, tile_m, vmem_limit)
    grid = (pl.cdiv(M, tm),)

    # Advisory cost: true (unpadded) contraction / output sizes only.
    cost = pl.CostEstimate(
        flops=2 * M * K * E,
        transcendentals=0,
        bytes_accessed=M * K * in_item + K * E * w_item + E * 4 + M * E * out_item,
    )

    return pl.pallas_call(
        _patch_proj_kernel,
        out_shape=jax.ShapeDtypeStruct((M, E), out_dtype),
        grid_spec=pltpu.PrefetchScalarGridSpec(
            num_scalar_prefetch=0,
            grid=grid,
            in_specs=[
                pl.BlockSpec((tm, K), lambda i: (i, 0)),   # M-tiled activation
                pl.BlockSpec((K, E), lambda i: (0, 0)),    # weight: VMEM-resident
                pl.BlockSpec((1, E), lambda i: (0, 0)),    # bias:   VMEM-resident
            ],
            out_specs=pl.BlockSpec((tm, E), lambda i: (i, 0)),
        ),
        compiler_params=pltpu.CompilerParams(
            dimension_semantics=("parallel",),   # independent M tiles (megacore / 2 TC)
            vmem_limit_bytes=vmem_limit,
        ),
        cost_estimate=cost,
    )(patches, weight, bias2d)


# ------------------------------ PatchEmbed -------------------------------------
class PatchEmbed:
    """JAX/Pallas port of the PyTorch PatchEmbed module (norm_layer=None)."""

    def __init__(self, img_size=16, patch_size=4, in_chans=4, embed_dim=32,
                 compute_dtype=jnp.bfloat16, out_dtype=None, key=None):
        self.img_size = (img_size, img_size)
        self.patch_size = (patch_size, patch_size)
        self.patches_resolution = [img_size // patch_size, img_size // patch_size]
        self.num_patches = self.patches_resolution[0] * self.patches_resolution[1]
        self.in_chans = in_chans
        self.embed_dim = embed_dim
        self.compute_dtype = compute_dtype
        self.out_dtype = out_dtype if out_dtype is not None else compute_dtype

        if key is None:
            key = jax.random.PRNGKey(0)
        kw, kb = jax.random.split(key)
        # nn.Conv2d weight shape: (embed_dim, in_chans, ph, pw); deterministic init.
        fan_in = in_chans * patch_size * patch_size
        bound = 1.0 / (fan_in ** 0.5)
        self.proj_weight = jax.random.uniform(
            kw, (embed_dim, in_chans, patch_size, patch_size),
            minval=-bound, maxval=bound, dtype=jnp.float32)
        self.proj_bias = jax.random.uniform(
            kb, (embed_dim,), minval=-bound, maxval=bound, dtype=jnp.float32)

        # ---- precomputed projection operands (tiny; done once, no padding) ----
        K = in_chans * patch_size * patch_size
        self._K = K
        # (E, C, ph, pw) -> (K, E) flattened in (C, ph, pw) order (matches OIHW).
        self._w2d = self.proj_weight.reshape(embed_dim, K).T.astype(compute_dtype)
        self._bias2d = self.proj_bias.reshape(1, embed_dim)   # f32, added to f32 acc

        self._forward = jax.jit(self._forward_impl)

    def _forward_impl(self, x):
        # x: (B, C, H, W)  NCHW
        B, C, H, W = x.shape
        ph, pw = self.patch_size
        # Same padding semantics as the PyTorch forward (pad right/bottom).
        pad_h = (ph - H % ph) % ph
        pad_w = (pw - W % pw) % pw
        if pad_h or pad_w:
            x = jnp.pad(x, ((0, 0), (0, 0), (0, pad_h), (0, pad_w)))
            H, W = H + pad_h, W + pad_w
        Hp, Wp = H // ph, W // pw

        # Cast to the (bf16) compute dtype BEFORE the im2col transpose so the
        # convert fuses into the same single XLA copy (halves the copy's write bytes).
        xc = x.astype(self.compute_dtype)

        # im2col (XLA glue): (B,C,Hp,ph,Wp,pw) -> (B,Hp,Wp,C,ph,pw) so the flattened
        # K ordering (C, ph, pw) matches the OIHW Conv2d weight flatten.  One fused
        # copy under jit; K is NOT padded (kernel block last dim == full K is legal).
        # TODO(synk): fuse this reorder into the kernel (strip BlockSpec + in-VMEM
        # flatten) — avoided here because the sub-(8,128) 4-D transpose is a Mosaic
        # lowering risk at these tile sizes.
        patches = xc.reshape(B, C, Hp, ph, Wp, pw).transpose(0, 2, 4, 1, 3, 5)
        patches = patches.reshape(B * Hp * Wp, C * ph * pw)

        out = _patch_proj(patches, self._w2d, self._bias2d, self.out_dtype)  # (M, E)
        return out.reshape(B, Hp * Wp, self.embed_dim)   # (B, num_patches, embed_dim)

    def __call__(self, x):
        return self._forward(x)


# ------------------------------- reference --------------------------------------
def _reference(x, weight, bias, patch):
    # Pure-JAX f32 reference via lax.conv_general_dilated (== Conv2d stride=kernel).
    y = jax.lax.conv_general_dilated(
        x, weight, window_strides=(patch, patch), padding="VALID",
        dimension_numbers=("NCHW", "OIHW", "NCHW"))
    y = y + bias.reshape(1, -1, 1, 1)
    B, E, Hp, Wp = y.shape
    return y.reshape(B, E, Hp * Wp).transpose(0, 2, 1)


if __name__ == "__main__":
    B, C, IMG, PATCH, EMBED = 2, 4, 16, 4, 32
    key = jax.random.PRNGKey(0)
    kx, kp = jax.random.split(key)
    x = jax.random.normal(kx, (B, C, IMG, IMG), dtype=jnp.float32)

    pe = PatchEmbed(img_size=IMG, patch_size=PATCH, in_chans=C,
                    embed_dim=EMBED, key=kp)

    out = jax.block_until_ready(pe(x))

    ref = _reference(x, pe.proj_weight, pe.proj_bias, PATCH)
    assert out.shape == (B, (IMG // PATCH) ** 2, EMBED), out.shape

    # bf16 operands / output -> looser tolerance (f32 accumulate keeps it tight-ish).
    if pe.compute_dtype == jnp.float32 and pe.out_dtype == jnp.float32:
        atol = rtol = 1e-4
    else:
        atol = rtol = 5e-2
    err = float(jnp.max(jnp.abs(out.astype(jnp.float32) - ref)))
    assert jnp.allclose(out.astype(jnp.float32), ref, atol=atol, rtol=rtol), err
    print("KERNEL_OK")
</pallas_src>

<mosaic_0001>
module attributes {stable_mosaic.version = 11 : i64} {
  func.func @_patch_proj_kernel(%arg0: i32, %arg1: memref<16x64xbf16, #tpu.memory_space<vmem>>, %arg2: memref<64x32xbf16, #tpu.memory_space<vmem>>, %arg3: memref<1x32xf32, #tpu.memory_space<vmem>>, %arg4: memref<16x32xbf16, #tpu.memory_space<vmem>>) attributes {dimension_semantics = [#tpu.dimension_semantics<parallel>], iteration_bounds = array<i64: 2>, scalar_prefetch = 0 : i64, scratch_operands = 0 : i64, tpu.core_type = #tpu.core_type<tc>, window_params = [{transform_indices = @transform_0, window_bounds = array<i64: 16, 64>}, {pipeline_mode = #tpu.pipeline_mode<synchronous>, transform_indices = @transform_1, window_bounds = array<i64: 64, 32>}, {pipeline_mode = #tpu.pipeline_mode<synchronous>, transform_indices = @transform_2, window_bounds = array<i64: 1, 32>}, {transform_indices = @transform_3, window_bounds = array<i64: 16, 32>}]} {
    %c0 = arith.constant 0 : index
    %c0_0 = arith.constant 0 : index
    %0 = vector.load %arg1[%c0, %c0_0] : memref<16x64xbf16, #tpu.memory_space<vmem>>, vector<16x64xbf16>
    %c0_1 = arith.constant 0 : index
    %c0_2 = arith.constant 0 : index
    %1 = vector.load %arg2[%c0_1, %c0_2] : memref<64x32xbf16, #tpu.memory_space<vmem>>, vector<64x32xbf16>
    %cst = arith.constant dense<0.000000e+00> : vector<16x32xf32>
    %2 = tpu.matmul %0, %1, %cst {dimension_numbers = #tpu.dot_dimension_numbers<[1], [0], [0], [1], [0, 0, 1, 1], [], []>} : vector<16x64xbf16>, vector<64x32xbf16>, vector<16x32xf32> -> vector<16x32xf32>
    %c0_3 = arith.constant 0 : index
    %c0_4 = arith.constant 0 : index
    %3 = vector.load %arg3[%c0_3, %c0_4] : memref<1x32xf32, #tpu.memory_space<vmem>>, vector<1x32xf32>
    %4 = vector.broadcast %3 : vector<1x32xf32> to vector<16x32xf32>
    %5 = arith.addf %2, %4 : vector<16x32xf32>
    %6 = arith.truncf %5 : vector<16x32xf32> to vector<16x32xbf16>
    %c0_5 = arith.constant 0 : index
    %c0_6 = arith.constant 0 : index
    %7 = vector.load %arg4[%c0_5, %c0_6] : memref<16x32xbf16, #tpu.memory_space<vmem>>, vector<16x32xbf16>
    tpu.vector_store %arg4[%c0_5, %c0_6], %6 {strides = array<i32>} : memref<16x32xbf16, #tpu.memory_space<vmem>>, vector<16x32xbf16>,
    return
  }
  func.func @transform_0(%arg0: i32) -> (i32, i32) {
    %c0_i32 = arith.constant 0 : i32
    %c0_i32_0 = arith.constant 0 : i32
    return %arg0, %c0_i32 : i32, i32
  }
  func.func @transform_1(%arg0: i32) -> (i32, i32) {
    %c0_i32 = arith.constant 0 : i32
    %c0_i32_0 = arith.constant 0 : i32
    %c0_i32_1 = arith.constant 0 : i32
    return %c0_i32, %c0_i32_0 : i32, i32
  }
  func.func @transform_2(%arg0: i32) -> (i32, i32) {
    %c0_i32 = arith.constant 0 : i32
    %c0_i32_0 = arith.constant 0 : i32
    %c0_i32_1 = arith.constant 0 : i32
    return %c0_i32, %c0_i32_0 : i32, i32
  }
  func.func @transform_3(%arg0: i32) -> (i32, i32) {
    %c0_i32 = arith.constant 0 : i32
    %c0_i32_0 = arith.constant 0 : i32
    return %arg0, %c0_i32 : i32, i32
  }
}

</mosaic_0001>

<bundles_post_ra>
// kernel: _forward_impl.1
= control target key start
LH: loop header
LB: loop body
LE: loop exit
PB: predicated region body
PF: predicated region fallthrough
CT: control target
= control target key end

     0   :  { %8 = vsyncpa [#allocation3], 0  ;;  %s643_s0 = inlined_call_operand.vmem [shape: bf16[32,64], index: 0, kind: input, shape index: {}]   ;;  %s644_s1 = inlined_call_operand.vmem [shape: bf16[64,32], index: 1, kind: input, shape index: {}]   ;;  %s645_s2 = inlined_call_operand.vmem [shape: f32[1,32], index: 2, kind: input, shape index: {}]   ;;  %s646_s3 = inlined_call_operand.hbm [shape: bf16[32,32], index: 3, kind: output, shape index: {}]  }
   0x1   :  { %10 = vsyncpa [#allocation3 + $0x1], 0  ;;  %s527_s12 = smov 0   ;;  %s529_s13 = smov 0  }
   0x2   :  { %s531_s14 = smov 0   ;;  %s533_s15 = smov 0  }
   0x3 LB: > { %s548_s16 = sadd.s32 4294967295, %s500_s15   ;;  %s351_s17 = sadd.s32 4294967294, %s500_s15   ;;  %s500_s15 = sphi %s533_s15, %s652_s15   ;;  %s496_s14 = sphi %s531_s14, %s651_s14   ;;  %s492_s13 = sphi %s529_s13, %s650_s13   ;;  %s488_s12 = sphi %s527_s12, %s649_s12  }
   0x4   : > { %s552_s18 = sadd.s32 1, %s500_s15   ;;  %s91_s19 = sadd.s32 1, %s496_s14 }
   0x5   : > { %s88_s20 = ssub.s32 %s500_s15, %s552_s18  ;;  %p101_p0 = scmp.ne.s32.totalorder %s496_s14, %s492_s13 }
   0x6   : > { %p89_p1 = scmp.eq.s32.totalorder %s88_s20, 0  ;;  %p102_p2 = scmp.eq.s32.totalorder %s548_s16, 1 }
   0x7   : > { %p107_p3 = scmp.ne.s32.totalorder %s492_s13, %s488_s12  ;;  %p108_p4 = scmp.eq.s32.totalorder %s351_s17, 1 }
   0x8   : > { %s563_s21 = scalar_select %p89_p1, %s496_s14, %s91_s19  }
   0x9   : > { %p565_p5 = por %p102_p2, %p101_p0  ;;  %p569_p6 = por %p108_p4, %p107_p3 }
   0xa   : > { %p354_p7 = scmp.ge.s32.totalorder %s500_s15, 1  ;;  %p141_p8 = scmp.lt.s32.totalorder %s500_s15, 3 }
   0xc   : > { %p142_p9 = pnand %p354_p7, %p141_p8 }
   0xd   : > { %s356_s28 = sshll.u32 (!%p142_p9), %s548_s16, 1  ;;  %s162_s10 = sand.u32 (!%p142_p9), 1, %s492_s13  }
   0xe   : > { %145 = sbr.rel (%p142_p9) target bundleno = 251 (0xfb), region = 32  ;;  %p166_p10 = scmp.lt.s32.totalorder (!%p142_p9), %s356_s28, 3 }
   0xf   : > { %s355_s19 = sshll.u32 (!%p142_p9), %s162_s10, 3  ;;  %s374_s25 = sshll.u32 (!%p142_p9), %s548_s16, 7 }
  0x10   : > { %s164_s20 = scalar_lea.vmem (!%p142_p9), [#allocation2], %s355_s19  ;;  %s603_s29 = scalar_lea.sflag (!%p142_p9), [#allocation3], %s162_s10 }
  0x11   : > { %s289_s24 = sshll.u32 (!%p142_p9), %s164_s20, 4  ;;  %s504_s16 = smov (!%p142_p9), [#allocation2]   ;;  %s596_s24 = int_to_ptr.vmem [resolvable:$true] %s289_s24 }
  0x12   : > { %s440_s30 = scalar_lea.vmem (!%p142_p9), %s596_s24, 128 }
  0x13   : > { %v435_v0 = vld [vmem:[%s644_s1 + $0x18] sm:$0xff]   ;;  %v502_v1 = vmov 0.0   ;;  %v436_v2 = vld [vmem:[%s644_s1 + $0x10] sm:$0xff]   ;;  %vm503_vm0 = vmmov 0   ;;  %s654_s28 = smov (!%p166_p10, %s356_s28), 3  ;;  %v437_v3 = vld [vmem:[%s644_s1 + $0x8] sm:$0xff]   ;;  %p441_p11 = scmp.ne.s32.totalorder %s596_s24, %s440_s30 }
  0x14   : > { %380 = vmatprep.subr.bf16.mxu0 %v502_v1  ;;  %388 = vmatprep.mubr.msk.bf16.mxu0 %vm503_vm0, %v502_v1  ;;  %s357_s4 = sshll.u32 %s654_s28, 2  ;;  %v438_v4 = vld [vmem:[%s644_s1] sm:$0xff]   ;;  %vm219_vm1 = vcmask 523264   ;;  %vm272_vm2 = vcmask 257024   ;;  %s601_s28 = scalar_lea.hbm %s646_s3, %s374_s25 }
  0x15   : > { %381 = vmatpush3.bf16.msra.mxu0 %v435_v0  ;;  %s169_s7 = scalar_lea.vmem %s643_s0, %s357_s4  ;;  %v358_v6 = vld [vmem:[%s645_s2] ss:$0 sm:$0xff]  ;;  %p442_p12 = pnand %p441_p11, %p565_p5 }
  0x16   : > { %382 = vmatprep.subr.bf16.mxu0 %v502_v1  ;;  %v439_v5 = vld [vmem:[%s169_s7] sm:$0xff]   ;;  %s444_s4 = sshll.u32 %s504_s16, 4  ;;  %s445_s4 = int_to_ptr.vmem [resolvable:$false] %s444_s4 }
  0x17   : > { %p443_p13 = pneg %p442_p12  ;;  %s446_s5 = scalar_lea.vmem %s445_s4, 256 }
  0x18   : > { %p447_p0 = scmp.lt.s32.totalorder %s596_s24, %s445_s4  ;;  %p448_p1 = scmp.lt.s32.totalorder %s446_s5, %s440_s30 }
  0x19   : > { %383 = vmatpush3.bf16.msra.mxu0 %v436_v2 }
  0x1a   : > { %384 = vmatprep.subr.bf16.mxu0 %v502_v1  ;;  %p449_p2 = por %p448_p1, %p447_p0 }
  0x1c   : > { %p450_p3 = pnand %p449_p2, %p443_p13 }
  0x1d   : > { %385 = vmatpush3.bf16.msra.mxu0 %v437_v3 }
  0x1e   : > { %386 = vmatprep.subr.bf16.mxu0 %v502_v1 }
  0x21   : > { %387 = vmatpush3.bf16.msra.mxu0 %v438_v4 }
  0x24   : > { %389 = vmatmul.mubr.msk.bf16.vlgmr.msra.gmra.mxu0 %vm219_vm1, %v439_v5 }
  0xe4   : > { %v257_v7 = vpop.f32.mrf.mxu0 }
  0xe5   : > { %v258_v8 = vadd.f32 %v358_v6, %v257_v7 }
  0xe6   : > { %v390_v9 = vpop.f32.mrf.mxu0 }
  0xe7   : > { %v372_v10 = vpack.c.bf16 %v258_v8, %v258_v8 }
  0xe8   : > { %v260_v11 = vpop.f32.mrf.mxu0 }
  0xe9   : > { %273 = vst.msk [vmem:[%s164_s20] sm:$0xf] %vm272_vm2, %v372_v10  ;;  %v261_v12 = vadd.f32 %v358_v6, %v260_v11 }
  0xea   : > { %v391_v13 = vpop.f32.mrf.mxu0 }
  0xeb   : > { %v373_v14 = vpack.c.bf16 %v261_v12, %v261_v12 }
  0xed   : > { %274 = vst.msk [vmem:[%s164_s20 + $0x4] sm:$0xf] %vm272_vm2, %v373_v14 }
  0xee   : > { %453 = shalt.err (!%p450_p3)
}
  0xef   : > { %s454_s6 = scalar_lea.hbm %s601_s28, 128  ;;  %s458_s9 = scalar_lea.hbm %s646_s3, 256 }
  0xf0   : > { %p455_p4 = scmp.ne.s32.totalorder %s601_s28, %s454_s6  ;;  %p459_p9 = scmp.lt.s32.totalorder %s601_s28, %s646_s3 }
  0xf1   : > { %p460_p10 = scmp.lt.s32.totalorder %s458_s9, %s454_s6 }
  0xf2   : > { %p456_p7 = pnand %p455_p4, %p565_p5 }
  0xf3   : > { %p461_p11 = por %p460_p10, %p459_p9 }
  0xf4   : > { %p457_p8 = pneg %p456_p7 }
  0xf6   : > { %p462_p12 = pnand %p461_p11, %p457_p8 }
  0xf8   : > { %465 = shalt.err (!%p462_p12)
}
  0xf9   : > { %s505_s17 = smov 64   ;;  %s506_s19 = smov 4  }
  0xfa   : > { %392 = dma.vmem_to_hbm [thread:$0]  (%p565_p5), %s596_s24, 128, %s601_s28, %s603_s29, %s505_s17, %s505_s17, %s506_s19  }
  0xfb PF: > { %p398_p13 = scmp.ge.s32.totalorder %s500_s15, 2  ;;  %s304_s20 = sand.u32 1, %s488_s12  }
  0xfc   : > { %s305_s25 = scalar_lea.sflag [#allocation3], %s304_s20 }
  0xfd   : > { %p395_p0 = pnand %p398_p13, %p569_p6 }
  0xff   : > { %p396_p1 = pneg %p395_p0 }
 0x101   : > { %483 = dma.done.wait (%p396_p1), %s305_s25, 128  }
 0x102   : > { %485 = vsyncadd (%p396_p1), %s305_s25, 4294967168  ;;  %p13_p2 = scmp.ge.s32.totalorder %s552_s18, 4   ;;  %s649_s12 = smov %s492_s13 }
 0x103   : > { %s650_s13 = smov %s496_s14  ;;  %s651_s14 = smov %s563_s21 }
 0x104   : > { %s652_s15 = smov %s552_s18  ;;  %15 = sbr.rel (!%p13_p2) target bundleno = 3 (0x3), region = 67 }
 0x109   :  { %310 = vsyncpa [#allocation3], 1 }
 0x10a   :  { %312 = vsyncpa [#allocation3 + $0x1], 1 }

</bundles_post_ra>
